<compile_context>
chip_gen: v6e
topology: v6e:2x2x1
jax: 0.10.0
libtpu: 0.0.40
codegen_flags: <defaults>
</compile_context>

<pallas_src>
import jax
import jax.numpy as jnp
from jax.experimental import pallas as pl
from jax.experimental.pallas import tpu as pltpu


# ---------------------------------------------------------------------------
# Fused MLP kernel:
#   relu(xW1+b1) -> relu(.W2+b2) -> relu(.W3+b3) -> (. @ W4 + b4) [on VPU/XLU]
# x is loaded f32 and cast to bf16 in-kernel; W1..W3 are bf16 (MXU inputs),
# W4 is (2, 64) f32; biases f32; all accumulation / elementwise math in f32.
# ---------------------------------------------------------------------------
def actor_mlp_kernel(x_ref,
                     w1_ref, b1_ref,
                     w2_ref, b2_ref,
                     w3_ref, b3_ref,
                     w4_ref, b4_ref,
                     out_ref):
    # In-kernel cast: a handful of VPU ops hidden under the matmuls, and it
    # avoids a separate XLA cast pass over x in HBM.
    x = x_ref[...].astype(jnp.bfloat16)                               # (TM, 8)

    h = jnp.dot(x, w1_ref[...], preferred_element_type=jnp.float32)  # (TM, 256)
    h = jnp.maximum(h + b1_ref[...], 0.0).astype(jnp.bfloat16)

    h = jnp.dot(h, w2_ref[...], preferred_element_type=jnp.float32)  # (TM, 256)
    h = jnp.maximum(h + b2_ref[...], 0.0).astype(jnp.bfloat16)

    h = jnp.dot(h, w3_ref[...], preferred_element_type=jnp.float32)  # (TM, 64)
    h = jnp.maximum(h + b3_ref[...], 0.0)                            # stays f32

    # Final 64->2 layer on the VPU/XLU (broadcast mul + lane reduce) instead
    # of burning a full MXU tile pass for an N=2 output.
    w4 = w4_ref[...]                                                  # (2, 64) f32
    y0 = jnp.sum(h * w4[0:1, :], axis=-1, keepdims=True)              # (TM, 1)
    y1 = jnp.sum(h * w4[1:2, :], axis=-1, keepdims=True)              # (TM, 1)
    out_ref[...] = jnp.concatenate([y0, y1], axis=-1) + b4_ref[...]   # (TM, 2)


# ---------------------------------------------------------------------------
# Wrapper
# ---------------------------------------------------------------------------
def actor_forward(state, params, *, tm=2048, core_parallel=False):
    """Fused ActorNetwork MLP. Returns (loc, scale) of Normal(loc, 0.2).

    params = ((w1,b1), (w2,b2), (w3,b3), (w4t,b4)); w1..w3 stored [in, out]
    in bf16, w4t stored [2, 64] in f32 (VPU layer), biases (1, out) f32.

    tm: batch tile. Default 2048 amortizes the ~0.35 us/step grid overhead on
    all generations; VMEM use stays well under the 16 MiB scoped default, so
    no vmem_limit_bytes bump is needed (raise tm + vmem_limit together if you
    want bigger tiles).

    core_parallel: set True on v7x to shard the batch grid axis across both
    TensorCores (pltpu.CORE_PARALLEL). Leave False on v5e/v6e.
    """
    (w1, b1), (w2, b2), (w3, b3), (w4t, b4) = params
    B, D = state.shape
    wbs = (w1, b1, w2, b2, w3, b3, w4t, b4)

    if B <= tm:
        # Small batch: single shot, no grid, no pipelining machinery.
        # Every operand is a whole-array VMEM block, DMA'd exactly once.
        loc = pl.pallas_call(
            actor_mlp_kernel,
            out_shape=jax.ShapeDtypeStruct((B, 2), jnp.float32),
            in_specs=[pl.BlockSpec(memory_space=pltpu.MemorySpace.VMEM)] * 9,
            out_specs=pl.BlockSpec(memory_space=pltpu.MemorySpace.VMEM),
        )(state, *wbs)
    else:
        # Rollout-sized batch: tile the batch axis. No host-side pad/slice —
        # Pallas masks the boundary block's partial reads/writes itself.
        # Weights/biases use a constant index_map so they stay VMEM-resident
        # across grid steps (DMA'd once).
        n_tiles = pl.cdiv(B, tm)
        batch_sem = pltpu.CORE_PARALLEL if core_parallel else "parallel"

        def resident_spec(shape):
            return pl.BlockSpec(shape, lambda i: (0, 0))

        loc = pl.pallas_call(
            actor_mlp_kernel,
            out_shape=jax.ShapeDtypeStruct((B, 2), jnp.float32),
            grid=(n_tiles,),
            in_specs=[
                pl.BlockSpec((tm, D), lambda i: (i, 0)),
                resident_spec(w1.shape), resident_spec(b1.shape),
                resident_spec(w2.shape), resident_spec(b2.shape),
                resident_spec(w3.shape), resident_spec(b3.shape),
                resident_spec(w4t.shape), resident_spec(b4.shape),
            ],
            out_specs=pl.BlockSpec((tm, 2), lambda i: (i, 0)),
            compiler_params=pltpu.CompilerParams(
                dimension_semantics=(batch_sem,)),
        )(state, *wbs)

    # Normal(loc, 0.2): scale is a broadcast constant — do not materialize it.
    return loc, 0.2


# ---------------------------------------------------------------------------
# Deterministic parameter init (PyTorch nn.Linear-style uniform).
# MXU-layer weights stored [in, out] and cast to bf16 once here; the final
# layer's weight is stored transposed (2, 64) in f32 for the in-kernel VPU
# contraction; biases stay f32.
# ---------------------------------------------------------------------------
def init_linear(key, in_f, out_f, *, weight_dtype=jnp.bfloat16, transpose=False):
    kw, kb = jax.random.split(key)
    bound = 1.0 / jnp.sqrt(jnp.float32(in_f))
    w = jax.random.uniform(kw, (in_f, out_f), jnp.float32, -bound, bound)
    b = jax.random.uniform(kb, (1, out_f), jnp.float32, -bound, bound)
    if transpose:
        w = w.T                                   # (out_f, in_f)
    return w.astype(weight_dtype), b


def reference_forward(state, params):
    """Pure-JAX reference using the same bf16-weight / f32-accumulate recipe."""
    (w1, b1), (w2, b2), (w3, b3), (w4t, b4) = params
    h = state.astype(jnp.bfloat16)
    h = jnp.maximum(jnp.dot(h, w1, preferred_element_type=jnp.float32) + b1,
                    0.0).astype(jnp.bfloat16)
    h = jnp.maximum(jnp.dot(h, w2, preferred_element_type=jnp.float32) + b2,
                    0.0).astype(jnp.bfloat16)
    h = jnp.maximum(jnp.dot(h, w3, preferred_element_type=jnp.float32) + b3,
                    0.0)
    return jnp.dot(h, w4t.T) + b4


def reference_forward_f32(state, params):
    """All-f32 reference (matches the original f32 PyTorch ActorNetwork)."""
    (w1, b1), (w2, b2), (w3, b3), (w4t, b4) = params
    h = state
    h = jnp.maximum(h @ w1.astype(jnp.float32) + b1, 0.0)
    h = jnp.maximum(h @ w2.astype(jnp.float32) + b2, 0.0)
    h = jnp.maximum(h @ w3.astype(jnp.float32) + b3, 0.0)
    return h @ w4t.astype(jnp.float32).T + b4


if __name__ == "__main__":
    key = jax.random.PRNGKey(0)
    k_x, k1, k2, k3, k4 = jax.random.split(key, 5)

    params = (
        init_linear(k1, 8, 256),                                     # lnn1
        init_linear(k2, 256, 256),                                   # lnn1a
        init_linear(k3, 256, 64),                                    # lnn1b
        init_linear(k4, 64, 2, weight_dtype=jnp.float32,
                    transpose=True),                                 # lnn2 (VPU layer)
    )

    # 1) Tiny batch -> single-shot (no-grid) path.
    state_small = jax.random.normal(k_x, (8, 8), jnp.float32)
    loc_s, scale = actor_forward(state_small, params)
    loc_s = jax.block_until_ready(loc_s)
    ref_s = reference_forward(state_small, params)
    ref_s_f32 = reference_forward_f32(state_small, params)
    assert loc_s.shape == (8, 2)
    assert scale == 0.2
    assert jnp.allclose(loc_s, ref_s, atol=1e-2, rtol=1e-2), "small-batch mismatch"
    assert jnp.allclose(loc_s, ref_s_f32, atol=1e-1, rtol=1e-1), "f32 drift too large"

    # 2) Batched path -> grid over batch tiles with VMEM-resident weights.
    #    B=300, tm=128 exercises the multi-step grid AND the unpadded
    #    boundary block (300 = 2*128 + 44) with no host-side pad/slice.
    state_big = jax.random.normal(k_x, (300, 8), jnp.float32)
    loc_b, _ = actor_forward(state_big, params, tm=128)
    loc_b = jax.block_until_ready(loc_b)
    ref_b = reference_forward(state_big, params)
    ref_b_f32 = reference_forward_f32(state_big, params)
    assert loc_b.shape == (300, 2)
    assert jnp.allclose(loc_b, ref_b, atol=1e-2, rtol=1e-2), "batched mismatch"
    assert jnp.allclose(loc_b, ref_b_f32, atol=1e-1, rtol=1e-1), "f32 drift too large"

    print("KERNEL_OK")
</pallas_src>

<mosaic_0001>
module attributes {stable_mosaic.version = 11 : i64} {
  func.func @actor_mlp_kernel(%arg0: memref<8x8xf32, #tpu.memory_space<vmem>>, %arg1: memref<8x256xbf16, #tpu.memory_space<vmem>>, %arg2: memref<1x256xf32, #tpu.memory_space<vmem>>, %arg3: memref<256x256xbf16, #tpu.memory_space<vmem>>, %arg4: memref<1x256xf32, #tpu.memory_space<vmem>>, %arg5: memref<256x64xbf16, #tpu.memory_space<vmem>>, %arg6: memref<1x64xf32, #tpu.memory_space<vmem>>, %arg7: memref<2x64xf32, #tpu.memory_space<vmem>>, %arg8: memref<1x2xf32, #tpu.memory_space<vmem>>, %arg9: memref<8x2xf32, #tpu.memory_space<vmem>>) attributes {dimension_semantics = [], scalar_prefetch = 0 : i64, scratch_operands = 0 : i64, tpu.core_type = #tpu.core_type<tc>} {
    %c0 = arith.constant 0 : index
    %c0_0 = arith.constant 0 : index
    %0 = vector.load %arg0[%c0, %c0_0] : memref<8x8xf32, #tpu.memory_space<vmem>>, vector<8x8xf32>
    %1 = arith.truncf %0 : vector<8x8xf32> to vector<8x8xbf16>
    %c0_1 = arith.constant 0 : index
    %c0_2 = arith.constant 0 : index
    %2 = vector.load %arg1[%c0_1, %c0_2] : memref<8x256xbf16, #tpu.memory_space<vmem>>, vector<8x256xbf16>
    %cst = arith.constant dense<0.000000e+00> : vector<8x256xf32>
    %3 = tpu.matmul %1, %2, %cst {dimension_numbers = #tpu.dot_dimension_numbers<[1], [0], [0], [1], [0, 0, 1, 1], [], []>} : vector<8x8xbf16>, vector<8x256xbf16>, vector<8x256xf32> -> vector<8x256xf32>
    %c0_3 = arith.constant 0 : index
    %c0_4 = arith.constant 0 : index
    %4 = vector.load %arg2[%c0_3, %c0_4] : memref<1x256xf32, #tpu.memory_space<vmem>>, vector<1x256xf32>
    %5 = vector.broadcast %4 : vector<1x256xf32> to vector<8x256xf32>
    %6 = arith.addf %3, %5 : vector<8x256xf32>
    %cst_5 = arith.constant 0.000000e+00 : f32
    %7 = vector.broadcast %cst_5 : f32 to vector<8x256xf32>
    %8 = arith.maximumf %6, %7 : vector<8x256xf32>
    %9 = arith.truncf %8 : vector<8x256xf32> to vector<8x256xbf16>
    %c0_6 = arith.constant 0 : index
    %c0_7 = arith.constant 0 : index
    %10 = vector.load %arg3[%c0_6, %c0_7] : memref<256x256xbf16, #tpu.memory_space<vmem>>, vector<256x256xbf16>
    %cst_8 = arith.constant dense<0.000000e+00> : vector<8x256xf32>
    %11 = tpu.matmul %9, %10, %cst_8 {dimension_numbers = #tpu.dot_dimension_numbers<[1], [0], [0], [1], [0, 0, 1, 1], [], []>} : vector<8x256xbf16>, vector<256x256xbf16>, vector<8x256xf32> -> vector<8x256xf32>
    %c0_9 = arith.constant 0 : index
    %c0_10 = arith.constant 0 : index
    %12 = vector.load %arg4[%c0_9, %c0_10] : memref<1x256xf32, #tpu.memory_space<vmem>>, vector<1x256xf32>
    %13 = vector.broadcast %12 : vector<1x256xf32> to vector<8x256xf32>
    %14 = arith.addf %11, %13 : vector<8x256xf32>
    %cst_11 = arith.constant 0.000000e+00 : f32
    %15 = vector.broadcast %cst_11 : f32 to vector<8x256xf32>
    %16 = arith.maximumf %14, %15 : vector<8x256xf32>
    %17 = arith.truncf %16 : vector<8x256xf32> to vector<8x256xbf16>
    %c0_12 = arith.constant 0 : index
    %c0_13 = arith.constant 0 : index
    %18 = vector.load %arg5[%c0_12, %c0_13] : memref<256x64xbf16, #tpu.memory_space<vmem>>, vector<256x64xbf16>
    %cst_14 = arith.constant dense<0.000000e+00> : vector<8x64xf32>
    %19 = tpu.matmul %17, %18, %cst_14 {dimension_numbers = #tpu.dot_dimension_numbers<[1], [0], [0], [1], [0, 0, 1, 1], [], []>} : vector<8x256xbf16>, vector<256x64xbf16>, vector<8x64xf32> -> vector<8x64xf32>
    %c0_15 = arith.constant 0 : index
    %c0_16 = arith.constant 0 : index
    %20 = vector.load %arg6[%c0_15, %c0_16] : memref<1x64xf32, #tpu.memory_space<vmem>>, vector<1x64xf32>
    %21 = vector.broadcast %20 : vector<1x64xf32> to vector<8x64xf32>
    %22 = arith.addf %19, %21 : vector<8x64xf32>
    %cst_17 = arith.constant 0.000000e+00 : f32
    %23 = vector.broadcast %cst_17 : f32 to vector<8x64xf32>
    %24 = arith.maximumf %22, %23 : vector<8x64xf32>
    %c0_18 = arith.constant 0 : index
    %c0_19 = arith.constant 0 : index
    %25 = vector.load %arg7[%c0_18, %c0_19] : memref<2x64xf32, #tpu.memory_space<vmem>>, vector<2x64xf32>
    %26 = vector.extract_strided_slice %25 {offsets = [0, 0], sizes = [1, 64], strides = [1, 1]} : vector<2x64xf32> to vector<1x64xf32>
    %27 = vector.broadcast %26 : vector<1x64xf32> to vector<8x64xf32>
    %28 = arith.mulf %24, %27 : vector<8x64xf32>
    %cst_20 = arith.constant dense<0.000000e+00> : vector<8xf32>
    %29 = vector.multi_reduction <add>, %28, %cst_20 [1] : vector<8x64xf32> to vector<8xf32>
    %30 = vector.shape_cast %29 : vector<8xf32> to vector<8x1xf32>
    %31 = vector.extract_strided_slice %25 {offsets = [1, 0], sizes = [1, 64], strides = [1, 1]} : vector<2x64xf32> to vector<1x64xf32>
    %32 = vector.broadcast %31 : vector<1x64xf32> to vector<8x64xf32>
    %33 = arith.mulf %24, %32 : vector<8x64xf32>
    %cst_21 = arith.constant dense<0.000000e+00> : vector<8xf32>
    %34 = vector.multi_reduction <add>, %33, %cst_21 [1] : vector<8x64xf32> to vector<8xf32>
    %35 = vector.shape_cast %34 : vector<8xf32> to vector<8x1xf32>
    %36 = tpu.concatenate %30, %35 in 1 : vector<8x1xf32>, vector<8x1xf32> -> vector<8x2xf32>
    %c0_22 = arith.constant 0 : index
    %c0_23 = arith.constant 0 : index
    %37 = vector.load %arg8[%c0_22, %c0_23] : memref<1x2xf32, #tpu.memory_space<vmem>>, vector<1x2xf32>
    %38 = vector.broadcast %37 : vector<1x2xf32> to vector<8x2xf32>
    %39 = arith.addf %36, %38 : vector<8x2xf32>
    %c0_24 = arith.constant 0 : index
    %c0_25 = arith.constant 0 : index
    %40 = vector.load %arg9[%c0_24, %c0_25] : memref<8x2xf32, #tpu.memory_space<vmem>>, vector<8x2xf32>
    tpu.vector_store %arg9[%c0_24, %c0_25], %39 {strides = array<i32>} : memref<8x2xf32, #tpu.memory_space<vmem>>, vector<8x2xf32>,
    return
  }
}

</mosaic_0001>

<bundles_post_ra>
// kernel: tpu_custom_call.1
= control target key start
LH: loop header
LB: loop body
LE: loop exit
PB: predicated region body
PF: predicated region fallthrough
CT: control target
= control target key end

     0   :  { %14 = vsyncpa [#allocation3], 0  ;;  %s751_s30 = smov [#allocation2]   ;;  %s880_s0 = inlined_call_operand.vmem [shape: f32[8,8], index: 0, kind: input, shape index: {}]   ;;  %s881_s1 = inlined_call_operand.vmem [shape: bf16[8,256], index: 1, kind: input, shape index: {}]   ;;  %s882_s2 = inlined_call_operand.vmem [shape: f32[1,256], index: 2, kind: input, shape index: {}]   ;;  %s883_s3 = inlined_call_operand.hbm [shape: bf16[256,256], index: 3, kind: input, shape index: {}]   ;;  %s884_s4 = inlined_call_operand.vmem [shape: f32[1,256], index: 4, kind: input, shape index: {}]   ;;  %s885_s5 = inlined_call_operand.vmem [shape: bf16[256,64], index: 5, kind: input, shape index: {}]   ;;  %s886_s6 = inlined_call_operand.vmem [shape: f32[1,64], index: 6, kind: input, shape index: {}]   ;;  %s887_s7 = inlined_call_operand.vmem [shape: f32[2,64], index: 7, kind: input, shape index: {}]   ;;  %s888_s8 = inlined_call_operand.vmem [shape: f32[1,2], index: 8, kind: input, shape index: {}]   ;;  %s889_s9 = inlined_call_operand.vmem [shape: f32[8,2], index: 9, kind: output, shape index: {}]  }
   0x1   :  { %s26_s10 = sshll.u32 %s751_s30, 4  ;;  %s27_s10 = int_to_ptr.vmem [resolvable:$true] %s26_s10 }
   0x2   :  { %s737_s11 = scalar_lea.vmem %s27_s10, 4096  ;;  %p742_p1 = scmp.lt.s32.totalorder %s27_s10, %s27_s10 }
   0x3   :  { %p738_p0 = scmp.ne.s32.totalorder %s27_s10, %s737_s11  ;;  %p743_p2 = scmp.lt.s32.totalorder %s737_s11, %s737_s11 }
   0x5   :  { %p744_p3 = por %p743_p2, %p742_p1 }
   0x7   :  { %p745_p4 = pnand %p744_p3, %p738_p0 }
   0x9   :  { %748 = shalt.err (!%p745_p4)
}
   0xa   :  { %s752_s12 = smov 128   ;;  %s753_s13 = smov 8  }
   0xb   :  { %32 = dma.hbm_to_vmem [thread:$0]  %s883_s3, 4096, %s27_s10, [#allocation3], %s752_s12, %s752_s12, %s753_s13  }
   0xc   :  { %749 = dma.done.wait [#allocation3], 4096  }
   0xd   :  { %750 = vsyncadd [#allocation3], 4294963200  ;;  %v754_v0 = vmov 0   ;;  %v49_v1 = vld [vmem:[%s881_s1] sm:$0xff]  ;;  %vm71_vm0 = vcmask 1043456   ;;  %vm67_vm1 = vcmask 64512   ;;  %v52_v51 = vlaneseq }
   0xe   :  { %110 = vmatprep.mubr.bf16.mxu0 %v754_v0  ;;  %v47_v2 = vld [vmem:[%s880_s0] sm:$0xff]  ;;  %v584_v3 = vcombine.high %v49_v1, %v49_v1  ;;  %v583_v4 = vcombine.low %v49_v1, %v49_v1  ;;  %v665_v5 = vld [vmem:[#allocation2 + $0x74] ss:$8 sps:$4 sm:$0xff]   ;;  %v667_v6 = vld [vmem:[#allocation2 + $0x70] ss:$8 sps:$4 sm:$0xff]   ;;  %vm554_vm2 = vcmask 523264  }
   0xf   :  { %v668_v7 = vld [vmem:[#allocation2 + $0x64] ss:$8 sps:$4 sm:$0xff]   ;;  %v48_v9 = vpack.c.bf16 %v47_v2, %v47_v2  ;;  %327 = vmatprep.subr.bf16.mxu1 %v665_v5  ;;  %v670_v10 = vld [vmem:[#allocation2 + $0x60] ss:$8 sps:$4 sm:$0xff]   ;;  %v671_v11 = vld [vmem:[#allocation2 + $0x54] ss:$8 sps:$4 sm:$0xff]  }
  0x10   :  { %585 = vmatprep.subr.msk.bf16.mxu0 %vm71_vm0, %v584_v3  ;;  %v73_v8 = vsel %vm71_vm0, %v583_v4, 0  ;;  %328 = vmatpush1.bf16.msra.mxu1 %v667_v6  ;;  %v673_v12 = vld [vmem:[#allocation2 + $0x50] ss:$8 sps:$4 sm:$0xff]   ;;  %v674_v13 = vld [vmem:[#allocation2 + $0x44] ss:$8 sps:$4 sm:$0xff]   ;;  %v53_v52 = vshrl.u32 %v52_v51, 7 }
  0x11   :  { %93 = vmatpush1.bf16.msra.mxu0 %v73_v8  ;;  %329 = vmatprep.subr.bf16.mxu1 %v668_v7  ;;  %v676_v14 = vld [vmem:[#allocation2 + $0x40] ss:$8 sps:$4 sm:$0xff]   ;;  %v677_v15 = vld [vmem:[#allocation2 + $0x34] ss:$8 sps:$4 sm:$0xff]   ;;  %v679_v16 = vld [vmem:[#allocation2 + $0x30] ss:$8 sps:$4 sm:$0xff]  }
  0x12   :  { %v680_v17 = vld [vmem:[#allocation2 + $0x24] ss:$8 sps:$4 sm:$0xff]   ;;  %v682_v18 = vld [vmem:[#allocation2 + $0x20] ss:$8 sps:$4 sm:$0xff]   ;;  %v683_v19 = vld [vmem:[#allocation2 + $0x14] ss:$8 sps:$4 sm:$0xff]  }
  0x13   :  { %v685_v20 = vld [vmem:[#allocation2 + $0x10] ss:$8 sps:$4 sm:$0xff]   ;;  %v686_v21 = vld [vmem:[#allocation2 + $0x4] ss:$8 sps:$4 sm:$0xff]   ;;  %v688_v22 = vld [vmem:[#allocation2] ss:$8 sps:$4 sm:$0xff]  }
  0x14   :  { %586 = vmatmul.mubr.msk.bf16.vlgmr.msra.gmra.mxu0 %vm67_vm1, %v48_v9  ;;  %330 = vmatpush1.bf16.msra.mxu1 %v670_v10  ;;  %v689_v23 = vld [vmem:[#allocation2 + $0xf4] ss:$8 sps:$4 sm:$0xff]   ;;  %v691_v24 = vld [vmem:[#allocation2 + $0xf0] ss:$8 sps:$4 sm:$0xff]   ;;  %v692_v25 = vld [vmem:[#allocation2 + $0xe4] ss:$8 sps:$4 sm:$0xff]  }
  0x15   :  { %331 = vmatprep.subr.bf16.mxu1 %v671_v11  ;;  %v694_v26 = vld [vmem:[#allocation2 + $0xe0] ss:$8 sps:$4 sm:$0xff]   ;;  %v695_v27 = vld [vmem:[#allocation2 + $0xd4] ss:$8 sps:$4 sm:$0xff]   ;;  %v697_v28 = vld [vmem:[#allocation2 + $0xd0] ss:$8 sps:$4 sm:$0xff]  }
  0x16   :  { %v698_v29 = vld [vmem:[#allocation2 + $0xc4] ss:$8 sps:$4 sm:$0xff]   ;;  %v700_v30 = vld [vmem:[#allocation2 + $0xc0] ss:$8 sps:$4 sm:$0xff]   ;;  %v701_v31 = vld [vmem:[#allocation2 + $0xb4] ss:$8 sps:$4 sm:$0xff]  }
  0x17   :  { %v703_v32 = vld [vmem:[#allocation2 + $0xb0] ss:$8 sps:$4 sm:$0xff]   ;;  %v704_v33 = vld [vmem:[#allocation2 + $0xa4] ss:$8 sps:$4 sm:$0xff]   ;;  %v706_v34 = vld [vmem:[#allocation2 + $0xa0] ss:$8 sps:$4 sm:$0xff]  }
  0x18   :  { %332 = vmatpush1.bf16.msra.mxu1 %v673_v12  ;;  %v707_v35 = vld [vmem:[#allocation2 + $0x94] ss:$8 sps:$4 sm:$0xff]   ;;  %v709_v36 = vld [vmem:[#allocation2 + $0x90] ss:$8 sps:$4 sm:$0xff]   ;;  %v710_v37 = vld [vmem:[#allocation2 + $0x84] ss:$8 sps:$4 sm:$0xff]  }
  0x19   :  { %333 = vmatprep.subr.bf16.mxu1 %v674_v13  ;;  %v712_v38 = vld [vmem:[#allocation2 + $0x80] ss:$8 sps:$4 sm:$0xff]   ;;  %v713_v39 = vld [vmem:[%s885_s5 + $0x78] sm:$0xff]   ;;  %v715_v41 = vld [vmem:[%s885_s5 + $0x70] sm:$0xff]   ;;  %v54_v53 = vsub.s32 0, %v53_v52  ;;  %v58_v55 = vsub.s32 1, %v53_v52 }
  0x1a   :  { %v714_v40 = vld [vmem:[%s885_s5 + $0x38] sm:$0xff]   ;;  %637 = vmatprep.subr.bf16.mxu0 %v713_v39  ;;  %v716_v42 = vld [vmem:[%s885_s5 + $0x30] sm:$0xff]   ;;  %v717_v43 = vld [vmem:[%s885_s5 + $0x68] sm:$0xff]   ;;  %vm566_vm3 = vcmask 7168   ;;  %vm576_vm4 = vcmask 15360  }
  0x1b   :  { %638 = vmatpush3.bf16.msra.mxu0 %v714_v40  ;;  %v718_v44 = vld [vmem:[%s885_s5 + $0x28] sm:$0xff]   ;;  %v719_v45 = vld [vmem:[%s885_s5 + $0x60] sm:$0xff]   ;;  %v721_v47 = vld [vmem:[%s885_s5 + $0x58] sm:$0xff]  }
  0x1c   :  { %334 = vmatpush1.bf16.msra.mxu1 %v676_v14  ;;  %639 = vmatprep.subr.bf16.mxu0 %v715_v41  ;;  %v720_v46 = vld [vmem:[%s885_s5 + $0x20] sm:$0xff]   ;;  %v722_v48 = vld [vmem:[%s885_s5 + $0x18] sm:$0xff]   ;;  %v723_v49 = vld [vmem:[%s885_s5 + $0x50] sm:$0xff]  }
  0x1d   :  { %335 = vmatprep.subr.bf16.mxu1 %v677_v15  ;;  %v724_v50 = vld [vmem:[%s885_s5 + $0x10] sm:$0xff]   ;;  %v50_v54 = vld [vmem:[%s882_s2] sm:$0x3]  ;;  %v725_v4 = vld [vmem:[%s885_s5 + $0x48] sm:$0xff]  }
  0x1e   :  { %v55_v56 = vrot.slane %v50_v54, %v54_v53  ;;  %v59_v57 = vrot.slane %v50_v54, %v58_v55  ;;  %v726_v5 = vld [vmem:[%s885_s5 + $0x8] sm:$0xff]   ;;  %v727_v6 = vld [vmem:[%s885_s5 + $0x40] sm:$0xff]  }
  0x1f   :  { %640 = vmatpush3.bf16.msra.mxu0 %v716_v42  ;;  %v728_v7 = vld [vmem:[%s885_s5] sm:$0xff]  }
  0x20   :  { %336 = vmatpush1.bf16.msra.mxu1 %v679_v16  ;;  %641 = vmatprep.subr.bf16.mxu0 %v717_v43  ;;  %v155_v8 = vld [vmem:[%s884_s4] sm:$0x3] }
  0x21   :  { %337 = vmatprep.subr.bf16.mxu1 %v680_v17  ;;  %v160_v9 = vrot.slane %v155_v8, %v54_v53  ;;  %v164_v10 = vrot.slane %v155_v8, %v58_v55 }
  0x23   :  { %642 = vmatpush3.bf16.msra.mxu0 %v718_v44 }
  0x24   :  { %338 = vmatpush1.bf16.msra.mxu1 %v682_v18  ;;  %643 = vmatprep.subr.bf16.mxu0 %v719_v45 }
  0x25   :  { %339 = vmatprep.subr.bf16.mxu1 %v683_v19 }
  0x27   :  { %644 = vmatpush3.bf16.msra.mxu0 %v720_v46 }
  0x28   :  { %340 = vmatpush1.bf16.msra.mxu1 %v685_v20  ;;  %645 = vmatprep.subr.bf16.mxu0 %v721_v47 }
  0x29   :  { %341 = vmatprep.subr.bf16.mxu1 %v686_v21 }
  0x2b   :  { %646 = vmatpush3.bf16.msra.mxu0 %v722_v48 }
  0x2c   :  { %342 = vmatpush1.bf16.msra.mxu1 %v688_v22  ;;  %647 = vmatprep.subr.bf16.mxu0 %v723_v49  ;;  %v619_v22 = vld [vmem:[%s886_s6] ss:$0 sm:$0xff] }
  0x2d   :  { %343 = vmatprep.subr.bf16.mxu1 %v689_v23 }
  0x2f   :  { %648 = vmatpush3.bf16.msra.mxu0 %v724_v50 }
  0x30   :  { %344 = vmatpush2.bf16.msra.mxu1 %v691_v24  ;;  %649 = vmatprep.subr.bf16.mxu0 %v725_v4  ;;  %v548_v24 = vld [vmem:[%s887_s7] sm:$0x3] }
  0x31   :  { %345 = vmatprep.subr.bf16.mxu1 %v692_v25 }
  0x33   :  { %650 = vmatpush3.bf16.msra.mxu0 %v726_v5 }
  0x34   :  { %346 = vmatpush2.bf16.msra.mxu1 %v694_v26  ;;  %651 = vmatprep.subr.bf16.mxu0 %v727_v6 }
  0x35   :  { %347 = vmatprep.subr.bf16.mxu1 %v695_v27 }
  0x37   :  { %652 = vmatpush3.bf16.msra.mxu0 %v728_v7 }
  0x38   :  { %348 = vmatpush2.bf16.msra.mxu1 %v697_v28  ;;  %v552_v28 = vrot.slane %v548_v24, %v54_v53 }
  0x39   :  { %349 = vmatprep.subr.bf16.mxu1 %v698_v29 }
  0x3c   :  { %350 = vmatpush2.bf16.msra.mxu1 %v700_v30 }
  0x3d   :  { %351 = vmatprep.subr.bf16.mxu1 %v701_v31  ;;  %v561_v31 = vrot.slane %v548_v24, %v58_v55 }
  0x40   :  { %352 = vmatpush2.bf16.msra.mxu1 %v703_v32 }
  0x41   :  { %353 = vmatprep.subr.bf16.mxu1 %v704_v33 }
  0x44   :  { %354 = vmatpush2.bf16.msra.mxu1 %v706_v34 }
  0x45   :  { %355 = vmatprep.subr.bf16.mxu1 %v707_v35 }
  0x48   :  { %356 = vmatpush2.bf16.msra.mxu1 %v709_v36 }
  0x49   :  { %357 = vmatprep.subr.bf16.mxu1 %v710_v37  ;;  %v636_v37 = vld [vmem:[%s888_s8] ss:$0 sm:$0xff] }
  0x4c   :  { %358 = vmatpush2.bf16.msra.mxu1 %v712_v38 }
  0xd4   :  { %v112_v58 = vpop.f32.mrf.mxu0 }
  0xd5   :  { %v113_v59 = vadd.f32 %v112_v58, %v55_v56 }
  0xd6   :  { %v114_v60 = vpop.f32.mrf.mxu0 }
  0xd7   :  { %v115_v61 = vadd.f32 %v114_v60, %v59_v57  ;;  %v119_v62 = vmax.f32 %v113_v59, 0.0 }
  0xd8   :  { %v116_v63 = vpop.f32.mrf.mxu0 }
  0xd9   :  { %v120_v0 = vmax.f32 %v115_v61, 0.0  ;;  %v121_v3 = vpack.c.bf16 %v119_v62, %v119_v62 }
  0xda   :  { %v117_v1 = vpop.f32.mrf.mxu0 }
  0xdb   :  { %v122_v2 = vpack.c.bf16 %v120_v0, %v120_v0 }
  0xdd   :  { %359 = vmatprep.mubr.bf16.mxu1 %v122_v2 }
  0xde   :  { %360 = vmatmul.mubr.bf16.vlgmr.msra.gmra.mxu1 %v121_v3 }
 0x19e   :  { %v361_v11 = vpop.f32.mrf.mxu1 }
 0x19f   :  { %v362_v12 = vadd.f32 %v361_v11, %v160_v9 }
 0x1a0   :  { %v363_v13 = vpop.f32.mrf.mxu1 }
 0x1a1   :  { %v364_v14 = vadd.f32 %v363_v13, %v164_v10  ;;  %v368_v15 = vmax.f32 %v362_v12, 0.0 }
 0x1a2   :  { %v365_v16 = vpop.f32.mrf.mxu1 }
 0x1a3   :  { %v369_v17 = vmax.f32 %v364_v14, 0.0  ;;  %v370_v20 = vpack.c.bf16 %v368_v15, %v368_v15 }
 0x1a4   :  { %v366_v18 = vpop.f32.mrf.mxu1 }
 0x1a5   :  { %v371_v19 = vpack.c.bf16 %v369_v17, %v369_v17 }
 0x1a7   :  { %539 = vmatprep.mubr.bf16.mxu0 %v371_v19 }
 0x1a8   :  { %540 = vmatmul.mubr.bf16.vlgmr.msra.gmra.mxu0 %v370_v20 }
 0x268   :  { %v653_v21 = vpop.f32.mrf.mxu0 }
 0x26a   :  { %v654_v23 = vpop.f32.mrf.mxu0 }
 0x26b   :  { %v655_v25 = vadd.f32 %v654_v23, %v653_v21 }
 0x26c   :  { %v656_v26 = vpop.f32.mrf.mxu0 }
 0x26d   :  { %v542_v27 = vadd.f32 %v655_v25, %v619_v22 }
 0x26e   :  { %v657_v29 = vpop.f32.mrf.mxu0 }
 0x26f   :  { %v547_v30 = vmax.f32 %v542_v27, 0.0 }
 0x271   :  { %v553_v32 = vmul.f32 %v552_v28, %v547_v30  ;;  %v562_v34 = vmul.f32 %v561_v31, %v547_v30 }
 0x273   :  { %v555_v33 = vsel %vm554_vm2, %v553_v32, 0.0  ;;  %v563_v35 = vsel %vm554_vm2, %v562_v34, 0.0 }
 0x274   :  { %556 = vadd.xlane.f32.xlu0 %v555_v33 }
 0x278   :  { %564 = vadd.xlane.f32.xlu0 %v563_v35 }
 0x2fd   :  { %v557_v36 = vpop.xlane.xlu0 %556 }
 0x301   :  { %v565_v38 = vpop.xlane.xlu0 %564 }
 0x302   :  { %v567_v39 = vsel %vm566_vm3, %v557_v36, %v565_v38 }
 0x303   :  { %v575_v40 = vadd.f32 %v636_v37, %v567_v39 }
 0x305   :  { %577 = vst.msk [vmem:[%s889_s9] sm:$0xff] %vm576_vm4, %v575_v40 }
 0x306   :  { %582 = vsyncpa [#allocation3], 1 }

</bundles_post_ra>
